<compile_context>
chip_gen: v7x
topology: tpu7x:2x2x1
jax: 0.10.0
libtpu: 0.0.40
codegen_flags: <defaults>
</compile_context>

<pallas_src>
import jax
import jax.numpy as jnp
from jax.experimental import pallas as pl
from jax.experimental.pallas import tpu as pltpu

LANES = 128
SUBLANES = 8
MAX_BLOCK_ROWS = 4096          # (4096,128) f32 = 2 MiB/block; 2 streams x 2 bufs = 8 MiB
NUM_CHUNKS = 2                 # leading "parallel" axis (both TCs on v7x)
NEG_FILL = -100.0              # sigmoid(-100) ~ 0 in f32 -> padded lanes contribute nothing


def _round_up(x, m):
    return ((x + m - 1) // m) * m


def _ftl_partial_kernel(x_ref, t_ref, tp_ref, ps_ref, pt_ref):
    """Accumulate per-chunk vector partials of sum(s*t), sum(s), sum(t)."""

    @pl.when(pl.program_id(1) == 0)
    def _():
        tp_ref[...] = jnp.zeros_like(tp_ref)
        ps_ref[...] = jnp.zeros_like(ps_ref)
        pt_ref[...] = jnp.zeros_like(pt_ref)

    # Narrow-in-HBM, f32-in-vreg (v5e has no bf16 VALU/EUP).
    x = x_ref[...].astype(jnp.float32)          # (BR, 128)
    t = t_ref[...].astype(jnp.float32)          # padded targets are zero
    s = jax.nn.sigmoid(x)                       # padded logits -> sigmoid(-100) ~ 0

    def fold(v):
        # (BR, 128) -> (8, 128): pure VPU adds across BR//8 vregs (no per-iter XLU reduce).
        return jnp.sum(v.reshape(-1, SUBLANES, LANES), axis=0)

    tp_ref[...] += fold(s * t)[None]
    ps_ref[...] += fold(s)[None]
    pt_ref[...] += fold(t)[None]


def focal_tversky_loss(inputs, targets, smoothing=2.0, alpha=0.85, beta=0.15,
                       gamma=4.0 / 3.0):
    """Pallas implementation of FocalTverskyLoss.forward (returns a scalar)."""
    # --- glue (matches the PyTorch module's preprocessing) ---
    if targets.shape[1] > 1:
        targets = targets[:, 1, :, :]
        targets = targets[:, None, :, :]

    x = inputs.reshape(-1)
    t = targets.reshape(-1)
    assert x.shape == t.shape, "inputs/targets must match after channel select"
    if not jnp.issubdtype(x.dtype, jnp.floating):
        x = x.astype(jnp.float32)
    if not jnp.issubdtype(t.dtype, jnp.floating):
        t = t.astype(jnp.float32)

    n = x.shape[0]

    # Row geometry: rows of 128 lanes, blocks of block_rows rows, NUM_CHUNKS chunks.
    rows_needed = max(1, -(-n // LANES))
    block_rows = min(MAX_BLOCK_ROWS, _round_up(rows_needed, SUBLANES))
    total_rows = _round_up(rows_needed, NUM_CHUNKS * block_rows)
    blocks_per_chunk = total_rows // (NUM_CHUNKS * block_rows)
    pad = total_rows * LANES - n

    # No mask stream: pad logits very negative (sigmoid -> ~0), targets with zero.
    x2 = jnp.pad(x, (0, pad), constant_values=NEG_FILL).reshape(total_rows, LANES)
    t2 = jnp.pad(t, (0, pad)).reshape(total_rows, LANES)

    in_spec = pl.BlockSpec((block_rows, LANES),
                           lambda c, i: (c * blocks_per_chunk + i, 0))
    acc_spec = pl.BlockSpec((1, SUBLANES, LANES), lambda c, i: (c, 0, 0))
    acc_shape = jax.ShapeDtypeStruct((NUM_CHUNKS, SUBLANES, LANES), jnp.float32)

    tp_part, s_part, t_part = pl.pallas_call(
        _ftl_partial_kernel,
        out_shape=(acc_shape, acc_shape, acc_shape),
        grid_spec=pltpu.PrefetchScalarGridSpec(
            num_scalar_prefetch=0,
            grid=(NUM_CHUNKS, blocks_per_chunk),
            in_specs=[in_spec, in_spec],
            out_specs=[acc_spec, acc_spec, acc_spec],
        ),
        compiler_params=pltpu.CompilerParams(
            dimension_semantics=("parallel", "arbitrary")),
    )(x2, t2)

    # Tiny finalize in the wrapper: one cross-lane reduce per accumulator + scalar math.
    TP = jnp.sum(tp_part)
    S = jnp.sum(s_part)
    T = jnp.sum(t_part)
    FP = S - TP
    FN = T - TP
    tversky = (TP + smoothing) / (TP + alpha * FN + beta * FP + smoothing)
    return jnp.maximum(1.0 - tversky, 0.0) ** gamma


def focal_tversky_loss_ref(inputs, targets, smoothing=2.0, alpha=0.85,
                           beta=0.15, gamma=4.0 / 3.0):
    if targets.shape[1] > 1:
        targets = targets[:, 1, :, :][:, None, :, :]
    s = jax.nn.sigmoid(inputs.astype(jnp.float32)).reshape(inputs.shape[0], -1)
    t = targets.astype(jnp.float32).reshape(targets.shape[0], -1)
    TP = jnp.sum(s * t)
    FP = jnp.sum((1.0 - t) * s)
    FN = jnp.sum(t * (1.0 - s))
    tversky = (TP + smoothing) / (TP + alpha * FN + beta * FP + smoothing)
    return (1.0 - tversky) ** gamma


if __name__ == "__main__":
    key = jax.random.PRNGKey(0)
    k1, k2 = jax.random.split(key)

    # Single-channel logits, two-channel (background/foreground) targets:
    # exercises the `targets.shape[1] > 1` branch of the module.
    B, H, W = 2, 16, 16
    logits = jax.random.normal(k1, (B, 1, H, W), dtype=jnp.float32)
    fg = jax.random.bernoulli(k2, 0.3, (B, H, W)).astype(jnp.float32)
    targets = jnp.stack([1.0 - fg, fg], axis=1)  # (B, 2, H, W)

    loss = jax.block_until_ready(focal_tversky_loss(logits, targets))
    ref = focal_tversky_loss_ref(logits, targets)
    assert jnp.allclose(loss, ref, rtol=1e-5, atol=1e-6), (loss, ref)
    print("KERNEL_OK")
</pallas_src>

<mosaic_0001>
module attributes {stable_mosaic.version = 11 : i64} {
  func.func @_ftl_partial_kernel(%arg0: i32, %arg1: i32, %arg2: memref<8x128xf32, #tpu.memory_space<vmem>>, %arg3: memref<8x128xf32, #tpu.memory_space<vmem>>, %arg4: memref<1x8x128xf32, #tpu.memory_space<vmem>>, %arg5: memref<1x8x128xf32, #tpu.memory_space<vmem>>, %arg6: memref<1x8x128xf32, #tpu.memory_space<vmem>>) attributes {dimension_semantics = [#tpu.dimension_semantics<parallel>, #tpu.dimension_semantics<arbitrary>], iteration_bounds = array<i64: 2, 1>, scalar_prefetch = 0 : i64, scratch_operands = 0 : i64, tpu.core_type = #tpu.core_type<tc>, window_params = [{transform_indices = @transform_0, window_bounds = array<i64: 8, 128>}, {transform_indices = @transform_1, window_bounds = array<i64: 8, 128>}, {transform_indices = @transform_2, window_bounds = array<i64: 1, 8, 128>}, {transform_indices = @transform_3, window_bounds = array<i64: 1, 8, 128>}, {transform_indices = @transform_4, window_bounds = array<i64: 1, 8, 128>}]} {
    %c0_i32 = arith.constant 0 : i32
    %0 = arith.cmpi eq, %arg1, %c0_i32 : i32
    %1 = arith.extui %0 : i1 to i32
    %c0_i32_0 = arith.constant 0 : i32
    %2 = arith.cmpi ne, %1, %c0_i32_0 : i32
    scf.if %2 {
      %cst_25 = arith.constant 0.000000e+00 : f32
      %29 = vector.broadcast %cst_25 : f32 to vector<1x8x128xf32>
      %c0_26 = arith.constant 0 : index
      %c0_27 = arith.constant 0 : index
      %c0_28 = arith.constant 0 : index
      %30 = vector.load %arg4[%c0_26, %c0_27, %c0_28] : memref<1x8x128xf32, #tpu.memory_space<vmem>>, vector<1x8x128xf32>
      tpu.vector_store %arg4[%c0_26, %c0_27, %c0_28], %29 {strides = array<i32>} : memref<1x8x128xf32, #tpu.memory_space<vmem>>, vector<1x8x128xf32>,
      %cst_29 = arith.constant 0.000000e+00 : f32
      %31 = vector.broadcast %cst_29 : f32 to vector<1x8x128xf32>
      %c0_30 = arith.constant 0 : index
      %c0_31 = arith.constant 0 : index
      %c0_32 = arith.constant 0 : index
      %32 = vector.load %arg5[%c0_30, %c0_31, %c0_32] : memref<1x8x128xf32, #tpu.memory_space<vmem>>, vector<1x8x128xf32>
      tpu.vector_store %arg5[%c0_30, %c0_31, %c0_32], %31 {strides = array<i32>} : memref<1x8x128xf32, #tpu.memory_space<vmem>>, vector<1x8x128xf32>,
      %cst_33 = arith.constant 0.000000e+00 : f32
      %33 = vector.broadcast %cst_33 : f32 to vector<1x8x128xf32>
      %c0_34 = arith.constant 0 : index
      %c0_35 = arith.constant 0 : index
      %c0_36 = arith.constant 0 : index
      %34 = vector.load %arg6[%c0_34, %c0_35, %c0_36] : memref<1x8x128xf32, #tpu.memory_space<vmem>>, vector<1x8x128xf32>
      tpu.vector_store %arg6[%c0_34, %c0_35, %c0_36], %33 {strides = array<i32>} : memref<1x8x128xf32, #tpu.memory_space<vmem>>, vector<1x8x128xf32>,
    } else {
    }
    %c0 = arith.constant 0 : index
    %c0_1 = arith.constant 0 : index
    %3 = vector.load %arg2[%c0, %c0_1] : memref<8x128xf32, #tpu.memory_space<vmem>>, vector<8x128xf32>
    %c0_2 = arith.constant 0 : index
    %c0_3 = arith.constant 0 : index
    %4 = vector.load %arg3[%c0_2, %c0_3] : memref<8x128xf32, #tpu.memory_space<vmem>>, vector<8x128xf32>
    %5 = arith.negf %3 : vector<8x128xf32>
    %6 = math.exp %5 : vector<8x128xf32>
    %cst = arith.constant 1.000000e+00 : f32
    %7 = vector.broadcast %cst : f32 to vector<8x128xf32>
    %8 = arith.addf %7, %6 : vector<8x128xf32>
    %9 = arith.divf %7, %8 : vector<8x128xf32>
    %c0_4 = arith.constant 0 : index
    %c0_5 = arith.constant 0 : index
    %c0_6 = arith.constant 0 : index
    %10 = vector.load %arg4[%c0_4, %c0_5, %c0_6] : memref<1x8x128xf32, #tpu.memory_space<vmem>>, vector<1x8x128xf32>
    %11 = arith.mulf %9, %4 : vector<8x128xf32>
    %12 = vector.shape_cast %11 : vector<8x128xf32> to vector<1x8x128xf32>
    %cst_7 = arith.constant dense<0.000000e+00> : vector<8x128xf32>
    %13 = vector.multi_reduction <add>, %12, %cst_7 [0] : vector<1x8x128xf32> to vector<8x128xf32>
    %14 = vector.shape_cast %13 : vector<8x128xf32> to vector<1x8x128xf32>
    %15 = arith.addf %10, %14 : vector<1x8x128xf32>
    %c0_8 = arith.constant 0 : index
    %c0_9 = arith.constant 0 : index
    %c0_10 = arith.constant 0 : index
    %16 = vector.load %arg4[%c0_8, %c0_9, %c0_10] : memref<1x8x128xf32, #tpu.memory_space<vmem>>, vector<1x8x128xf32>
    tpu.vector_store %arg4[%c0_8, %c0_9, %c0_10], %15 {strides = array<i32>} : memref<1x8x128xf32, #tpu.memory_space<vmem>>, vector<1x8x128xf32>,
    %c0_11 = arith.constant 0 : index
    %c0_12 = arith.constant 0 : index
    %c0_13 = arith.constant 0 : index
    %17 = vector.load %arg5[%c0_11, %c0_12, %c0_13] : memref<1x8x128xf32, #tpu.memory_space<vmem>>, vector<1x8x128xf32>
    %18 = vector.shape_cast %9 : vector<8x128xf32> to vector<1x8x128xf32>
    %cst_14 = arith.constant dense<0.000000e+00> : vector<8x128xf32>
    %19 = vector.multi_reduction <add>, %18, %cst_14 [0] : vector<1x8x128xf32> to vector<8x128xf32>
    %20 = vector.shape_cast %19 : vector<8x128xf32> to vector<1x8x128xf32>
    %21 = arith.addf %17, %20 : vector<1x8x128xf32>
    %c0_15 = arith.constant 0 : index
    %c0_16 = arith.constant 0 : index
    %c0_17 = arith.constant 0 : index
    %22 = vector.load %arg5[%c0_15, %c0_16, %c0_17] : memref<1x8x128xf32, #tpu.memory_space<vmem>>, vector<1x8x128xf32>
    tpu.vector_store %arg5[%c0_15, %c0_16, %c0_17], %21 {strides = array<i32>} : memref<1x8x128xf32, #tpu.memory_space<vmem>>, vector<1x8x128xf32>,
    %c0_18 = arith.constant 0 : index
    %c0_19 = arith.constant 0 : index
    %c0_20 = arith.constant 0 : index
    %23 = vector.load %arg6[%c0_18, %c0_19, %c0_20] : memref<1x8x128xf32, #tpu.memory_space<vmem>>, vector<1x8x128xf32>
    %24 = vector.shape_cast %4 : vector<8x128xf32> to vector<1x8x128xf32>
    %cst_21 = arith.constant dense<0.000000e+00> : vector<8x128xf32>
    %25 = vector.multi_reduction <add>, %24, %cst_21 [0] : vector<1x8x128xf32> to vector<8x128xf32>
    %26 = vector.shape_cast %25 : vector<8x128xf32> to vector<1x8x128xf32>
    %27 = arith.addf %23, %26 : vector<1x8x128xf32>
    %c0_22 = arith.constant 0 : index
    %c0_23 = arith.constant 0 : index
    %c0_24 = arith.constant 0 : index
    %28 = vector.load %arg6[%c0_22, %c0_23, %c0_24] : memref<1x8x128xf32, #tpu.memory_space<vmem>>, vector<1x8x128xf32>
    tpu.vector_store %arg6[%c0_22, %c0_23, %c0_24], %27 {strides = array<i32>} : memref<1x8x128xf32, #tpu.memory_space<vmem>>, vector<1x8x128xf32>,
    return
  }
  func.func @transform_0(%arg0: i32, %arg1: i32) -> (i32, i32) {
    %c1_i32 = arith.constant 1 : i32
    %0 = arith.muli %arg0, %c1_i32 : i32
    %1 = arith.addi %0, %arg1 : i32
    %c0_i32 = arith.constant 0 : i32
    %c0_i32_0 = arith.constant 0 : i32
    return %1, %c0_i32 : i32, i32
  }
  func.func @transform_1(%arg0: i32, %arg1: i32) -> (i32, i32) {
    %c1_i32 = arith.constant 1 : i32
    %0 = arith.muli %arg0, %c1_i32 : i32
    %1 = arith.addi %0, %arg1 : i32
    %c0_i32 = arith.constant 0 : i32
    %c0_i32_0 = arith.constant 0 : i32
    return %1, %c0_i32 : i32, i32
  }
  func.func @transform_2(%arg0: i32, %arg1: i32) -> (i32, i32, i32) {
    %c0_i32 = arith.constant 0 : i32
    %c0_i32_0 = arith.constant 0 : i32
    %c0_i32_1 = arith.constant 0 : i32
    return %arg0, %c0_i32, %c0_i32_0 : i32, i32, i32
  }
  func.func @transform_3(%arg0: i32, %arg1: i32) -> (i32, i32, i32) {
    %c0_i32 = arith.constant 0 : i32
    %c0_i32_0 = arith.constant 0 : i32
    %c0_i32_1 = arith.constant 0 : i32
    return %arg0, %c0_i32, %c0_i32_0 : i32, i32, i32
  }
  func.func @transform_4(%arg0: i32, %arg1: i32) -> (i32, i32, i32) {
    %c0_i32 = arith.constant 0 : i32
    %c0_i32_0 = arith.constant 0 : i32
    %c0_i32_1 = arith.constant 0 : i32
    return %arg0, %c0_i32, %c0_i32_0 : i32, i32, i32
  }
}

</mosaic_0001>

<bundles_post_ra>
// kernel: tpu_custom_call.1
= control target key start
LH: loop header
LB: loop body
LE: loop exit
PB: predicated region body
PF: predicated region fallthrough
CT: control target
= control target key end

     0   :  { %s1173_s0 = inlined_call_operand.hbm [shape: f32[16,128], index: 0, kind: input, shape index: {}]   ;;  %s1174_s1 = inlined_call_operand.hbm [shape: f32[16,128], index: 1, kind: input, shape index: {}]   ;;  %s1175_s2 = inlined_call_operand.hbm [shape: f32[2,8,128], index: 2, kind: output, shape index: {0}]   ;;  %s1176_s3 = inlined_call_operand.hbm [shape: f32[2,8,128], index: 3, kind: output, shape index: {1}]   ;;  %s1177_s4 = inlined_call_operand.hbm [shape: f32[2,8,128], index: 4, kind: output, shape index: {2}]  }
   0x1   :  { %1182 = sst [smem:[#allocation15_spill]] %s1173_s0 }
   0x2   :  { %10 = vsyncpa [#allocation3], 0 }
   0x3   :  { %12 = vsyncpa [#allocation3 + $0x1], 0 }
   0x4   :  { %13 = vsyncpa [#allocation6], 0 }
   0x5   :  { %15 = vsyncpa [#allocation6 + $0x1], 0 }
   0x6   :  { %16 = vsyncpa [#allocation4], 0 }
   0x7   :  { %18 = vsyncpa [#allocation4 + $0x1], 0 }
   0x8   :  { %19 = vsyncpa [#allocation9], 0 }
   0x9   :  { %21 = vsyncpa [#allocation9 + $0x1], 0  ;;  %s873_s15 = smov 0   ;;  %s875_s16 = smov 0  }
   0xa   :  { %s877_s17 = smov 0   ;;  %s879_s18 = smov 0  }
   0xb   :  { %s881_s19 = smov 0   ;;  %s883_s20 = smov 0  }
   0xc LB: > { %s904_s21 = sadd.s32 4294967295, %s841_s20   ;;  %s1178_s22 = sadd.s32 4294967294, %s841_s20   ;;  %s841_s20 = sphi %s883_s20, %s27_s20   ;;  %s837_s19 = sphi %s881_s19, %s1203_s19   ;;  %s833_s18 = sphi %s879_s18, %s1202_s18   ;;  %s829_s17 = sphi %s877_s17, %s1201_s17   ;;  %s825_s16 = sphi %s875_s16, %s1200_s16   ;;  %s821_s15 = sphi %s873_s15, %s1199_s15  }
   0xd   : > { %s39_s23 = sadd.s32 1, %s837_s19  ;;  %s48_s24 = sadd.s32 1, %s829_s17 }
   0xe   : > { %p41_p0 = scmp.ge.s32.totalorder %s39_s23, 2  ;;  %p55_p1 = scmp.ne.s32.totalorder %s829_s17, %s825_s16 }
   0xf   : > { %p56_p2 = scmp.eq.s32.totalorder %s841_s20, 0  ;;  %p61_p3 = scmp.ne.s32.totalorder %s825_s16, %s821_s15 }
  0x10   : > { %s1205_s23 = smov (%p41_p0, %s39_s23), 0  ;;  %p62_p5 = scmp.eq.s32.totalorder %s904_s21, 0 }
  0x11   : > { %p916_p4 = por %p56_p2, %p55_p1  ;;  %s45_s26 = ssub.s32 %s837_s19, %s1205_s23 }
  0x12   : > { %p113_p6 = scmp.eq.s32.totalorder %s904_s21, 1  ;;  %p46_p7 = scmp.eq.s32.totalorder %s45_s26, 0 }
  0x13   : > { %p924_p8 = por %p62_p5, %p61_p3  ;;  %p119_p10 = scmp.eq.s32.totalorder %s1178_s22, 1 }
  0x14   : > { %p928_p9 = por %p113_p6, %p55_p1  ;;  %p580_p13 = scmp.lt.s32.totalorder %s841_s20, 2 }
  0x15   : > { %s1184_s27 = scalar_select %p924_p8, 1, 0 }
  0x16   : > { %s1185_s28 = scalar_select %p928_p9, 1, 0 }
  0x17   : > { %s935_s29 = scalar_select %p46_p7, %s829_s17, %s48_s24  }
  0x18   : > { %p937_p11 = por %p119_p10, %p61_p3  ;;  %s944_s5 = sand.u32 1, %s829_s17  }
  0x19   : > { %s534_s6 = sshll.u32 %s944_s5, 3  ;;  %s535_s7 = sshll.u32 %s837_s19, 7 }
  0x1a   : > { %s1186_s30 = scalar_select %p937_p11, 1, 0 }
  0x1b   : > { %s1187_s0 = sld [smem:[#allocation15_spill]]  ;;  %s195_s11 = scalar_lea.vmem [#allocation2], %s534_s6 }
  0x1c   : > { %s203_s12 = sshll.u32 %s195_s11, 4  ;;  %p961_p0 = pnand %p580_p13, %p916_p4  ;;  %s957_s12 = int_to_ptr.vmem [resolvable:$true] %s203_s12 }
  0x1d   : > { %s192_s14 = scalar_lea.sflag [#allocation3], %s944_s5 }
  0x1e   : > { %p637_p5 = pneg %p961_p0 }
  0x21   : > { %s953_s10 = scalar_lea.hbm %s1187_s0, %s535_s7  ;;  %s640_s25 = scalar_lea.hbm %s1187_s0, 256 }
  0x22   : > { %s635_s24 = scalar_lea.hbm %s953_s10, 128  ;;  %p641_p4 = scmp.lt.u32.totalorder %s953_s10, %s1187_s0 }
  0x23   : > { %p636_p3 = scmp.ne.s32.totalorder %s953_s10, %s635_s24  ;;  %p642_p10 = scmp.lt.u32.totalorder %s640_s25, %s635_s24 }
  0x24   : > { %p644_p12 = scmp.lt.u32.totalorder %s635_s24, %s953_s10 }
  0x25   : > { %p638_p6 = pnand %p637_p5, %p636_p3  ;;  %p643_p13 = por %p642_p10, %p641_p4 }
  0x27   : > { %p639_p7 = pneg %p638_p6  ;;  %p645_p1 = por %p644_p12, %p643_p13 }
  0x29   : > { %p646_p2 = pnand %p645_p1, %p639_p7 }
  0x2b   : > { %649 = shalt.err (!%p646_p2)
}
  0x2c   : > { %s650_s22 = scalar_lea.vmem %s957_s12, 128  ;;  %s843_s26 = smov [#allocation2]  }
  0x2d   : > { %p651_p3 = scmp.ne.s32.totalorder %s957_s12, %s650_s22  ;;  %s655_s8 = sshll.u32 %s843_s26, 4  ;;  %s656_s8 = int_to_ptr.vmem [resolvable:$false] %s655_s8 }
  0x2e   : > { %s657_s9 = scalar_lea.vmem %s656_s8, 256  ;;  %p658_p9 = scmp.lt.s32.totalorder %s957_s12, %s656_s8 }
  0x2f   : > { %p653_p6 = pnand %p651_p3, %p637_p5  ;;  %p659_p4 = scmp.lt.s32.totalorder %s657_s9, %s650_s22 }
  0x31   : > { %p654_p11 = pneg %p653_p6  ;;  %p660_p10 = por %p659_p4, %p658_p9 }
  0x33   : > { %p661_p12 = pnand %p660_p10, %p654_p11 }
  0x35   : > { %664 = shalt.err (!%p661_p12)
}
  0x36   : > { %566 = dma.hbm_to_vmem [thread:$0]  (!%p961_p0), %s953_s10, 128, %s957_s12, %s192_s14  }
  0x37   : > { %p1189_p1 = scmp.lt.s32.totalorder %s841_s20, 3  ;;  %p1190_p2 = scmp.ge.s32.totalorder %s841_s20, 1 }
  0x38   : > { %s1006_s11 = scalar_lea.hbm %s1174_s1, %s535_s7  ;;  %s214_s26 = scalar_lea.vmem [#allocation5], %s534_s6 }
  0x39   : > { %p997_p7 = pnand %p1190_p2, %p1189_p1  ;;  %s222_s8 = sshll.u32 %s214_s26, 4  ;;  %s223_s8 = int_to_ptr.vmem [resolvable:$true] %s222_s8 }
  0x3a   : > { %s211_s10 = scalar_lea.sflag [#allocation6], %s944_s5  ;;  %s665_s12 = scalar_lea.hbm %s1006_s11, 128 }
  0x3b   : > { %s1191_s24 = scalar_select %p997_p7, 1, 0 }
  0x3c   : > { %p666_p9 = scmp.ne.s32.totalorder %s1006_s11, %s665_s12  ;;  %s670_s7 = scalar_lea.hbm %s1174_s1, 256 }
  0x3d   : > { %p671_p3 = scmp.lt.u32.totalorder %s1006_s11, %s1174_s1  ;;  %p672_p6 = scmp.lt.u32.totalorder %s670_s7, %s665_s12 }
  0x3e   : > { %p668_p11 = pnand %p666_p9, %p637_p5  ;;  %p674_p10 = scmp.lt.u32.totalorder %s665_s12, %s1006_s11 }
  0x3f   : > { %p673_p4 = por %p672_p6, %p671_p3 }
  0x40   : > { %p669_p13 = pneg %p668_p11 }
  0x41   : > { %p675_p12 = por %p674_p10, %p673_p4 }
  0x43   : > { %p676_p1 = pnand %p675_p12, %p669_p13 }
  0x45   : > { %679 = shalt.err (!%p676_p1)
}
  0x46   : > { %s680_s5 = scalar_lea.vmem %s223_s8, 128  ;;  %s844_s6 = smov [#allocation5]  }
  0x47   : > { %p681_p2 = scmp.ne.s32.totalorder %s223_s8, %s680_s5  ;;  %s685_s26 = sshll.u32 %s844_s6, 4  ;;  %s686_s26 = int_to_ptr.vmem [resolvable:$false] %s685_s26 }
  0x48   : > { %s687_s14 = scalar_lea.vmem %s686_s26, 256  ;;  %p688_p8 = scmp.lt.s32.totalorder %s223_s8, %s686_s26 }
  0x49   : > { %p683_p9 = pnand %p681_p2, %p637_p5  ;;  %p689_p7 = scmp.lt.s32.totalorder %s687_s14, %s680_s5 }
  0x4b   : > { %p684_p11 = pneg %p683_p9  ;;  %p690_p3 = por %p689_p7, %p688_p8 }
  0x4d   : > { %p691_p6 = pnand %p690_p3, %p684_p11 }
  0x4f   : > { %694 = shalt.err (!%p691_p6)
}
  0x50   : > { %569 = dma.hbm_to_vmem [thread:$0]  (!%p961_p0), %s1006_s11, 128, %s223_s8, %s211_s10  }
  0x51   : > { %p1192_p13 = scmp.ne.s32.totalorder %s1191_s24, 0 }
  0x52   : > { %s1033_s12 = sand.u32 (!%p1192_p13), 1, %s825_s16   ;;  %p1193_p8 = scmp.ne.s32.totalorder (!%p1192_p13), %s1184_s27, 0 }
  0x53   : > { %231 = sbr.rel (%p1192_p13) target bundleno = 180 (0xb4), region = 28  ;;  %s1036_s9 = sshll.u32 (!%p1192_p13), %s1033_s12, 3 }
  0x54   : > { %s234_s7 = scalar_lea.sflag (!%p1192_p13), [#allocation3], %s1033_s12  ;;  %s237_s22 = scalar_lea.vmem (!%p1192_p13), [#allocation2], %s1036_s9 }
  0x5a   : > { %804 = dma.done.wait (%p1193_p8), %s234_s7, 128  }
  0x5b   : > { %806 = vsyncadd (%p1193_p8), %s234_s7, 4294967168  ;;  %s243_s13 = scalar_lea.sflag [#allocation6], %s1033_s12  ;;  %s246_s24 = scalar_lea.vmem [#allocation5], %s1036_s9 }
  0x5c   : > { %808 = dma.done.wait (%p1193_p8), %s243_s13, 128  }
  0x5d   : > { %810 = vsyncadd (%p1193_p8), %s243_s13, 4294967168  ;;  %v295_v0 = vld [vmem:[%s237_s22] sm:$0xff]  ;;  %v296_v1 = vld [vmem:[%s246_s24] sm:$0xff]  ;;  %s285_s11 = scalar_lea.vmem [#allocation10], %s1036_s9  ;;  %s321_s8 = sand.u32 1, %s904_s21  }
  0x5e   : > { %v544_v2 = vmul.f32 -1.442695, %v295_v0  ;;  %315 = vst [vmem:[%s285_s11] sm:$0xff] %v296_v1  ;;  %s366_s10 = sshll.u32 %s285_s11, 4  ;;  %s548_s25 = sshll.u32 %s833_s18, 7  ;;  %s1054_s10 = int_to_ptr.vmem [resolvable:$true] %s366_s10 }
  0x5f   : > { %s278_s27 = scalar_lea.vmem [#allocation8], %s1036_s9  ;;  %s1181_s6 = scalar_lea.vmem [#allocation7], %s1036_s9 }
  0x60   : > { %631 = vpow2.f32 %v544_v2  ;;  %s353_s5 = sshll.u32 %s278_s27, 4  ;;  %s340_s26 = sshll.u32 %s1181_s6, 4  ;;  %s1064_s5 = int_to_ptr.vmem [resolvable:$true] %s353_s5  ;;  %s1076_s26 = int_to_ptr.vmem [resolvable:$true] %s340_s26 }
  0x61   : > { %s1062_s22 = scalar_lea.hbm %s1176_s3, %s548_s25  ;;  %s1069_s18 = scalar_lea.hbm %s1177_s4, %s548_s25 }
  0x62   : > { %s1074_s6 = scalar_lea.hbm %s1175_s2, %s548_s25  ;;  %s1078_s14 = scalar_lea.sflag [#allocation9], %s321_s8 }
  0x63   : > { %s695_s7 = scalar_lea.vmem %s1064_s5, 128  ;;  %p1194_p5 = scmp.ne.s32.totalorder %s1185_s28, 0 }
  0x64   : > { %p696_p0 = scmp.ne.s32.totalorder %s1064_s5, %s695_s7  ;;  %s845_s21 = smov [#allocation8]  }
  0x65   : > { %s699_s13 = sshll.u32 %s845_s21, 4  ;;  %s700_s13 = int_to_ptr.vmem [resolvable:$false] %s699_s13 }
  0x66   : > { %p697_p7 = pnand %p696_p0, %p1194_p5  ;;  %s701_s0 = scalar_lea.vmem %s700_s13, 256 }
  0x67   : > { %p702_p10 = scmp.lt.s32.totalorder %s1064_s5, %s700_s13  ;;  %p703_p12 = scmp.lt.s32.totalorder %s701_s0, %s695_s7 }
  0x68   : > { %p698_p4 = pneg %p697_p7 }
  0x69   : > { %p704_p1 = por %p703_p12, %p702_p10 }
  0x6a   : > { %v632_v3 = vpop.eup %631 }
  0x6b   : > { %v300_v4 = vadd.f32 1.0, %v632_v3  ;;  %p705_p2 = pnand %p704_p1, %p698_p4 }
  0x6d   : > { %633 = vrcp.f32 %v300_v4 }
  0x77   : > { %v634_v5 = vpop.eup %633 }
  0x78   : > { %v304_v6 = vmul.f32 %v634_v5, %v296_v1  ;;  %311 = vst [vmem:[%s278_s27] sm:$0xff] %v634_v5 }
  0x79   : > { %708 = shalt.err (!%p705_p2)
}
  0x7a   : > { %s709_s8 = scalar_lea.hbm %s1062_s22, 128  ;;  %s713_s24 = scalar_lea.hbm %s1176_s3, 256 }
  0x7b   : > { %p710_p9 = scmp.ne.s32.totalorder %s1062_s22, %s709_s8  ;;  %p714_p6 = scmp.lt.u32.totalorder %s1062_s22, %s1176_s3 }
  0x7c   : > { %p715_p13 = scmp.lt.u32.totalorder %s713_s24, %s709_s8  ;;  %p717_p0 = scmp.lt.u32.totalorder %s709_s8, %s1062_s22 }
  0x7d   : > { %p711_p11 = pnand %p710_p9, %p1194_p5 }
  0x7e   : > { %p716_p8 = por %p715_p13, %p714_p6 }
  0x7f   : > { %p712_p3 = pneg %p711_p11 }
  0x80   : > { %p718_p7 = por %p717_p0, %p716_p8 }
  0x82   : > { %p719_p4 = pnand %p718_p7, %p712_p3 }
  0x84   : > { %722 = shalt.err (!%p719_p4)
}
  0x85   : > { %558 = dma.vmem_to_hbm [thread:$0]  (%p1194_p5), %s1064_s5, 128, %s1062_s22, %s1078_s14  }
  0x86   : > { %s1195_s0 = scalar_lea.vmem [#allocation7], %s1036_s9  ;;  %s723_s7 = scalar_lea.vmem %s1054_s10, 128 }
  0x87   : > { %307 = vst [vmem:[%s1195_s0] sm:$0xff] %v304_v6  ;;  %p724_p10 = scmp.ne.s32.totalorder %s1054_s10, %s723_s7  ;;  %s846_s13 = smov [#allocation10]  }
  0x88   : > { %s727_s8 = sshll.u32 %s846_s13, 4  ;;  %s728_s8 = int_to_ptr.vmem [resolvable:$false] %s727_s8 }
  0x89   : > { %p725_p12 = pnand %p724_p10, %p1194_p5  ;;  %s729_s25 = scalar_lea.vmem %s728_s8, 256 }
  0x8a   : > { %p730_p2 = scmp.lt.s32.totalorder %s1054_s10, %s728_s8  ;;  %p731_p9 = scmp.lt.s32.totalorder %s729_s25, %s723_s7 }
  0x8b   : > { %p726_p1 = pneg %p725_p12 }
  0x8c   : > { %p732_p11 = por %p731_p9, %p730_p2 }
  0x8e   : > { %p733_p3 = pnand %p732_p11, %p726_p1 }
  0x90   : > { %736 = shalt.err (!%p733_p3)
}
  0x91   : > { %s737_s9 = scalar_lea.hbm %s1069_s18, 128  ;;  %s741_s27 = scalar_lea.hbm %s1177_s4, 256 }
  0x92   : > { %p738_p6 = scmp.ne.s32.totalorder %s1069_s18, %s737_s9  ;;  %p742_p0 = scmp.lt.u32.totalorder %s1069_s18, %s1177_s4 }
  0x93   : > { %p743_p7 = scmp.lt.u32.totalorder %s741_s27, %s737_s9  ;;  %p745_p10 = scmp.lt.u32.totalorder %s737_s9, %s1069_s18 }
  0x94   : > { %p739_p13 = pnand %p738_p6, %p1194_p5 }
  0x95   : > { %p744_p4 = por %p743_p7, %p742_p0 }
  0x96   : > { %p740_p8 = pneg %p739_p13 }
  0x97   : > { %p746_p12 = por %p745_p10, %p744_p4 }
  0x99   : > { %p747_p1 = pnand %p746_p12, %p740_p8 }
  0x9b   : > { %750 = shalt.err (!%p747_p1)
}
  0x9c   : > { %559 = dma.vmem_to_hbm [thread:$0]  (%p1194_p5), %s1054_s10, 128, %s1069_s18, %s1078_s14  }
  0x9d   : > { %s317_s21 = scalar_lea.sflag [#allocation4], %s1033_s12  ;;  %s751_s0 = scalar_lea.vmem %s1076_s26, 128 }
  0x9e   : > { %p752_p2 = scmp.ne.s32.totalorder %s1076_s26, %s751_s0  ;;  %s847_s7 = smov [#allocation7]  }
  0x9f   : > { %s755_s13 = sshll.u32 %s847_s7, 4  ;;  %s756_s13 = int_to_ptr.vmem [resolvable:$false] %s755_s13 }
  0xa0   : > { %p753_p9 = pnand %p752_p2, %p1194_p5  ;;  %s757_s8 = scalar_lea.vmem %s756_s13, 256 }
  0xa1   : > { %p758_p3 = scmp.lt.s32.totalorder %s1076_s26, %s756_s13  ;;  %p759_p6 = scmp.lt.s32.totalorder %s757_s8, %s751_s0 }
  0xa2   : > { %p754_p11 = pneg %p753_p9 }
  0xa3   : > { %p760_p13 = por %p759_p6, %p758_p3 }
  0xa5   : > { %p761_p8 = pnand %p760_p13, %p754_p11 }
  0xa7   : > { %764 = shalt.err (!%p761_p8)
}
  0xa8   : > { %s765_s12 = scalar_lea.hbm %s1074_s6, 128  ;;  %s769_s14 = scalar_lea.hbm %s1175_s2, 256 }
  0xa9   : > { %p766_p0 = scmp.ne.s32.totalorder %s1074_s6, %s765_s12  ;;  %p770_p10 = scmp.lt.u32.totalorder %s1074_s6, %s1175_s2 }
  0xaa   : > { %p771_p12 = scmp.lt.u32.totalorder %s769_s14, %s765_s12  ;;  %p773_p2 = scmp.lt.u32.totalorder %s765_s12, %s1074_s6 }
  0xab   : > { %p767_p7 = pnand %p766_p0, %p1194_p5 }
  0xac   : > { %p772_p1 = por %p771_p12, %p770_p10 }
  0xad   : > { %p768_p4 = pneg %p767_p7 }
  0xae   : > { %p774_p9 = por %p773_p2, %p772_p1 }
  0xb0   : > { %p775_p11 = pnand %p774_p9, %p768_p4 }
  0xb2   : > { %778 = shalt.err (!%p775_p11)
}
  0xb3   : > { %557 = dma.vmem_to_hbm [thread:$0]  (%p1194_p5), %s1076_s26, 128, %s1074_s6, %s317_s21  }
  0xb4 PF: > { %s378_s5 = sand.u32 1, %s821_s15   ;;  %p1196_p3 = scmp.ne.s32.totalorder %s1186_s30, 0 }
  0xb5   : > { %p1197_p6 = scmp.ge.s32.totalorder %s841_s20, 2  ;;  %s379_s22 = scalar_lea.sflag [#allocation4], %s378_s5 }
  0xb7   : > { %p571_p13 = pnand %p1197_p6, %p1196_p3 }
  0xb9   : > { %812 = dma.done.wait (!%p571_p13), %s379_s22, 128  }
  0xba   : > { %814 = vsyncadd (!%p571_p13), %s379_s22, 4294967168  ;;  %s1198_s27 = sadd.s32 4294967294, %s841_s20  }
  0xbb   : > { %s387_s24 = sand.u32 1, %s1198_s27  }
  0xbc   : > { %s388_s11 = scalar_lea.sflag [#allocation9], %s387_s24 }
  0xbd   : > { %816 = dma.done.wait (!%p571_p13), %s388_s11, 256  }
  0xbe   : > { %818 = vsyncadd (!%p571_p13), %s388_s11, 4294967040  ;;  %s27_s20 = sadd.s32 1, %s841_s20   ;;  %s1199_s15 = smov %s825_s16 }
  0xbf   : > { %p24_p5 = scmp.ge.s32.totalorder %s27_s20, 4   ;;  %s1200_s16 = smov %s829_s17 }
  0xc0   : > { %s1201_s17 = smov %s935_s29  ;;  %s1202_s18 = smov %s837_s19 }
  0xc1   : > { %s1203_s19 = smov %s1205_s23  ;;  %26 = sbr.rel (!%p24_p5) target bundleno = 12 (0xc), region = 122 }
  0xc8   :  { %402 = vsyncpa [#allocation3], 1 }
  0xc9   :  { %404 = vsyncpa [#allocation3 + $0x1], 1 }
  0xca   :  { %405 = vsyncpa [#allocation6], 1 }
  0xcb   :  { %407 = vsyncpa [#allocation6 + $0x1], 1 }
  0xcc   :  { %408 = vsyncpa [#allocation4], 1 }
  0xcd   :  { %410 = vsyncpa [#allocation4 + $0x1], 1 }
  0xce   :  { %411 = vsyncpa [#allocation9], 1 }
  0xcf   :  { %413 = vsyncpa [#allocation9 + $0x1], 1 }

</bundles_post_ra>
